<compile_context>
chip_gen: v7x
topology: tpu7x:2x2x1
jax: 0.10.0
libtpu: 0.0.40
codegen_flags: <defaults>
</compile_context>

<pallas_src>
import functools
import math

import jax
import jax.numpy as jnp
from jax.experimental import pallas as pl
from jax.experimental.pallas import tpu as pltpu


# ----------------------------------------------------------------------------
# generation-aware VMEM budget / tile caps
# ----------------------------------------------------------------------------
try:
    _VMEM_CAP = pltpu.get_tpu_info().vmem_capacity_bytes
except Exception:  # pragma: no cover - conservative fallback
    _VMEM_CAP = 128 * 1024 * 1024

if _VMEM_CAP >= 96 * 1024 * 1024:          # v5e / v6e (128 MiB VMEM)
    VMEM_LIMIT = 40 * 1024 * 1024
    TM_CAP, TK_CAP, TN_CAP = 512, 1024, 1024
else:                                      # v7x (64 MiB VMEM per TensorCore)
    VMEM_LIMIT = 28 * 1024 * 1024
    TM_CAP, TK_CAP, TN_CAP = 256, 512, 512


# ----------------------------------------------------------------------------
# helpers
# ----------------------------------------------------------------------------
def _round_up(n, m):
    return ((n + m - 1) // m) * m


def _pick_tile(dim, unit, cap):
    best = unit
    t = unit
    while t <= min(cap, dim):
        if dim % t == 0:
            best = t
        t += unit
    return best


def _sigmoid(x):
    return 1.0 / (1.0 + jnp.exp(-x))


def _erf(x):
    # Abramowitz & Stegun 7.1.26 rational approximation (f32-accurate); used
    # because erf has no guaranteed Mosaic lowering.
    a1, a2, a3, a4, a5 = 0.254829592, -0.284496736, 1.421413741, -1.453152027, 1.061405429
    p = 0.3275911
    sgn = jnp.where(x >= 0.0, 1.0, -1.0)
    ax = jnp.abs(x)
    t = 1.0 / (1.0 + p * ax)
    poly = ((((a5 * t + a4) * t + a3) * t + a2) * t + a1) * t
    return sgn * (1.0 - poly * jnp.exp(-ax * ax))


def _apply_act(x, act):
    if act == "none":
        return x
    if act == "silu":
        return x * _sigmoid(x)
    if act == "quick_gelu":                       # QuickGELU: x * sigmoid(1.702 x)
        return x * _sigmoid(1.702 * x)
    if act == "gelu":                             # exact (erf) GELU
        return 0.5 * x * (1.0 + _erf(x * (1.0 / math.sqrt(2.0))))
    raise ValueError(act)


# ----------------------------------------------------------------------------
# Pallas kernels
# ----------------------------------------------------------------------------
def _matmul_kernel(a_ref, w_ref, bias_ref, o_ref, acc_ref, *, act):
    @pl.when(pl.program_id(2) == 0)
    def _():
        acc_ref[...] = jnp.zeros_like(acc_ref)

    acc_ref[...] += jnp.dot(a_ref[...], w_ref[...],
                            preferred_element_type=jnp.float32)

    @pl.when(pl.program_id(2) == pl.num_programs(2) - 1)
    def _():
        o_ref[...] = _apply_act(acc_ref[...] + bias_ref[...], act).astype(o_ref.dtype)


def _matmul_gated_kernel(a_ref, g_ref, w_ref, bias_ref, o_ref, acc_ref, *, act):
    # fused GEGLU: A_eff = value * gelu(gate) (gelu already applied to g).
    @pl.when(pl.program_id(2) == 0)
    def _():
        acc_ref[...] = jnp.zeros_like(acc_ref)

    a = a_ref[...] * g_ref[...]
    acc_ref[...] += jnp.dot(a, w_ref[...], preferred_element_type=jnp.float32)

    @pl.when(pl.program_id(2) == pl.num_programs(2) - 1)
    def _():
        o_ref[...] = _apply_act(acc_ref[...] + bias_ref[...], act).astype(o_ref.dtype)


def _attn_kernel(q_ref, k_ref, v_ref, o_ref, m_sc, l_sc, acc_sc, *, hb, d, scale):
    # q/o blocks: [1, Sq, hb*d]; k/v blocks: [1, Skb, hb*d]; online softmax over
    # the kv grid axis; heads of the group are packed along lanes.
    kv = pl.program_id(2)

    @pl.when(kv == 0)
    def _():
        m_sc[...] = jnp.full_like(m_sc, -1e30)
        l_sc[...] = jnp.zeros_like(l_sc)
        acc_sc[...] = jnp.zeros_like(acc_sc)

    q = q_ref[0]
    k = k_ref[0]
    v = v_ref[0]
    for h in range(hb):
        sl = slice(h * d, (h + 1) * d)
        qh = q[:, sl] * scale                                   # bf16, scale folded
        s = jax.lax.dot_general(qh, k[:, sl], (((1,), (1,)), ((), ())),
                                preferred_element_type=jnp.float32)   # [Sq, Skb]
        m_prev = m_sc[:, h:h + 1]
        m_new = jnp.maximum(m_prev, jnp.max(s, axis=-1, keepdims=True))
        alpha = jnp.exp(m_prev - m_new)
        p = jnp.exp(s - m_new)
        l_sc[:, h:h + 1] = alpha * l_sc[:, h:h + 1] + jnp.sum(p, axis=-1, keepdims=True)
        acc_sc[:, sl] = alpha * acc_sc[:, sl] + jax.lax.dot_general(
            p.astype(jnp.bfloat16), v[:, sl], (((1,), (0,)), ((), ())),
            preferred_element_type=jnp.float32)
        m_sc[:, h:h + 1] = m_new

    @pl.when(kv == pl.num_programs(2) - 1)
    def _():
        parts = [acc_sc[:, h * d:(h + 1) * d] / l_sc[:, h:h + 1] for h in range(hb)]
        o_ref[0] = jnp.concatenate(parts, axis=-1).astype(o_ref.dtype)


def _layernorm_kernel(x_ref, g_ref, b_ref, o_ref, *, eps):
    x = x_ref[...].astype(jnp.float32)
    mean = jnp.mean(x, axis=-1, keepdims=True)
    var = jnp.mean((x - mean) ** 2, axis=-1, keepdims=True)
    y = (x - mean) * jax.lax.rsqrt(var + eps) * g_ref[...] + b_ref[...]
    o_ref[...] = y.astype(o_ref.dtype)


def _gn_stats_kernel(x_ref, o_ref, *, groups, eps, hw_total):
    # x block: [1, hwb, C]; o block: [1, 8, C] resident over the HW axis.
    # Rows 0/1 accumulate sum / sum-of-squares; at the last HW block they are
    # converted in place to per-channel mean / inv-std.
    j = pl.program_id(1)

    @pl.when(j == 0)
    def _():
        o_ref[...] = jnp.zeros_like(o_ref)

    x = x_ref[0].astype(jnp.float32)
    o_ref[0, 0:1, :] = o_ref[0, 0:1, :] + jnp.sum(x, axis=0, keepdims=True)
    o_ref[0, 1:2, :] = o_ref[0, 1:2, :] + jnp.sum(x * x, axis=0, keepdims=True)

    @pl.when(j == pl.num_programs(1) - 1)
    def _():
        C = x.shape[1]
        cg = C // groups
        ch = jax.lax.broadcasted_iota(jnp.int32, (C, groups), 0)
        gr = jax.lax.broadcasted_iota(jnp.int32, (C, groups), 1)
        ind_cg = (ch // cg == gr).astype(jnp.float32)            # [C, G]
        gr2 = jax.lax.broadcasted_iota(jnp.int32, (groups, C), 0)
        ch2 = jax.lax.broadcasted_iota(jnp.int32, (groups, C), 1)
        ind_gc = (ch2 // cg == gr2).astype(jnp.float32)          # [G, C]
        s1 = o_ref[0, 0:1, :]
        s2 = o_ref[0, 1:2, :]
        gs1 = jnp.dot(s1, ind_cg, preferred_element_type=jnp.float32)
        gs2 = jnp.dot(s2, ind_cg, preferred_element_type=jnp.float32)
        n = float(hw_total * cg)
        mean_g = gs1 / n
        var_g = jnp.maximum(gs2 / n - mean_g * mean_g, 0.0)
        inv_g = jax.lax.rsqrt(var_g + eps)
        o_ref[0, 0:1, :] = jnp.dot(mean_g, ind_gc, preferred_element_type=jnp.float32)
        o_ref[0, 1:2, :] = jnp.dot(inv_g, ind_gc, preferred_element_type=jnp.float32)


def _gn_apply_kernel(x_ref, stats_ref, g_ref, b_ref, o_ref, *, silu):
    x = x_ref[0].astype(jnp.float32)
    mean_c = stats_ref[0, 0:1, :]
    inv_c = stats_ref[0, 1:2, :]
    y = (x - mean_c) * inv_c * g_ref[...] + b_ref[...]
    if silu:
        y = y * _sigmoid(y)
    o_ref[0] = y.astype(o_ref.dtype)


def _eltwise_kernel(x_ref, o_ref, *, act):
    x = x_ref[...].astype(jnp.float32)
    o_ref[...] = _apply_act(x, act).astype(o_ref.dtype)


# ----------------------------------------------------------------------------
# matmul cores + jitted wrappers
# ----------------------------------------------------------------------------
def _mm_tiles(Mp, Kp, Np):
    tm = _pick_tile(Mp, 16, TM_CAP)
    tn = _pick_tile(Np, 128, TN_CAP)
    tk = _pick_tile(Kp, 128, TK_CAP) if Kp % 128 == 0 else Kp
    # keep >=2 blocks on a parallel axis when possible (v7x dual TensorCore)
    if Mp // tm == 1 and Np // tn == 1 and tm > 16:
        tm = _pick_tile(Mp, 16, max(16, tm // 2))
    return tm, tk, tn


def _mm(a, w, bias, act, n_out):
    # a: [M, K]; w: [Kp, Np] bf16 (pre-transposed, pre-padded); bias: [1, Np] f32.
    a = a.astype(jnp.bfloat16)
    M, K = a.shape
    Kp, Np = w.shape
    Mp = _round_up(M, 16)
    if Mp != M or Kp != K:
        a = jnp.pad(a, ((0, Mp - M), (0, Kp - K)))
    tm, tk, tn = _mm_tiles(Mp, Kp, Np)
    grid = (Mp // tm, Np // tn, Kp // tk)
    out = pl.pallas_call(
        functools.partial(_matmul_kernel, act=act),
        grid=grid,
        in_specs=[
            pl.BlockSpec((tm, tk), lambda i, j, k: (i, k)),
            pl.BlockSpec((tk, tn), lambda i, j, k: (k, j)),
            pl.BlockSpec((1, tn), lambda i, j, k: (0, j)),
        ],
        out_specs=pl.BlockSpec((tm, tn), lambda i, j, k: (i, j)),
        out_shape=jax.ShapeDtypeStruct((Mp, Np), jnp.bfloat16),
        scratch_shapes=[pltpu.VMEM((tm, tn), jnp.float32)],
        compiler_params=pltpu.CompilerParams(
            dimension_semantics=("parallel", "parallel", "arbitrary"),
            vmem_limit_bytes=VMEM_LIMIT),
    )(a, w, bias)
    if Mp != M or Np != n_out:
        out = out[:M, :n_out]
    return out


def _mm_gated(a, g, w, bias, act, n_out):
    a = a.astype(jnp.bfloat16)
    g = g.astype(jnp.bfloat16)
    M, K = a.shape
    Kp, Np = w.shape
    Mp = _round_up(M, 16)
    if Mp != M or Kp != K:
        a = jnp.pad(a, ((0, Mp - M), (0, Kp - K)))
        g = jnp.pad(g, ((0, Mp - M), (0, Kp - K)))
    tm, tk, tn = _mm_tiles(Mp, Kp, Np)
    grid = (Mp // tm, Np // tn, Kp // tk)
    out = pl.pallas_call(
        functools.partial(_matmul_gated_kernel, act=act),
        grid=grid,
        in_specs=[
            pl.BlockSpec((tm, tk), lambda i, j, k: (i, k)),
            pl.BlockSpec((tm, tk), lambda i, j, k: (i, k)),
            pl.BlockSpec((tk, tn), lambda i, j, k: (k, j)),
            pl.BlockSpec((1, tn), lambda i, j, k: (0, j)),
        ],
        out_specs=pl.BlockSpec((tm, tn), lambda i, j, k: (i, j)),
        out_shape=jax.ShapeDtypeStruct((Mp, Np), jnp.bfloat16),
        scratch_shapes=[pltpu.VMEM((tm, tn), jnp.float32)],
        compiler_params=pltpu.CompilerParams(
            dimension_semantics=("parallel", "parallel", "arbitrary"),
            vmem_limit_bytes=VMEM_LIMIT),
    )(a, g, w, bias)
    if Mp != M or Np != n_out:
        out = out[:M, :n_out]
    return out


@functools.partial(jax.jit, static_argnames=("act", "n_out"))
def _linear_fn(a, w, bias, *, act, n_out):
    return _mm(a, w, bias, act, n_out)


@functools.partial(jax.jit, static_argnames=("act", "n_out"))
def _gated_linear_fn(a, g, w, bias, *, act, n_out):
    return _mm_gated(a, g, w, bias, act, n_out)


@functools.partial(jax.jit, static_argnames=("H", "W", "stride", "act", "n_out"))
def _conv3x3_fn(x, w, bias, *, H, W, stride, act, n_out):
    # x: [B, H*W, Cin]; 3x3 conv, padding=1.  im2col patches built in bf16
    # directly at the packed K width (no separate K-pad copy).
    B, HW, Cin = x.shape
    Ho = (H + 2 - 3) // stride + 1
    Wo = (W + 2 - 3) // stride + 1
    Kp = w.shape[0]
    xb = x.astype(jnp.bfloat16).reshape(B, H, W, Cin)
    xp = jnp.pad(xb, ((0, 0), (1, 1), (1, 1), (0, 0)))
    cols = []
    for i in range(3):
        for j in range(3):
            cols.append(xp[:, i:i + stride * (Ho - 1) + 1:stride,
                           j:j + stride * (Wo - 1) + 1:stride, :])
    if Kp > 9 * Cin:
        cols.append(jnp.zeros((B, Ho, Wo, Kp - 9 * Cin), jnp.bfloat16))
    patches = jnp.concatenate(cols, axis=-1).reshape(B * Ho * Wo, Kp)
    out = _mm(patches, w, bias, act, n_out)
    return out.reshape(B, Ho * Wo, n_out)


def linear(x, p, act="none"):
    lead = x.shape[:-1]
    out = _linear_fn(x.reshape(-1, x.shape[-1]), p["w"], p["b"],
                     act=act, n_out=p["n"])
    return out.reshape(*lead, p["n"])


def gated_linear(a, g, p, act="none"):
    lead = a.shape[:-1]
    out = _gated_linear_fn(a.reshape(-1, a.shape[-1]), g.reshape(-1, g.shape[-1]),
                           p["w"], p["b"], act=act, n_out=p["n"])
    return out.reshape(*lead, p["n"])


def conv2d(x, p, H, W, act="none"):
    stride = p.get("stride", 1)
    if p["ksize"] == 1:
        B, HW, C = x.shape
        out = _linear_fn(x.reshape(B * HW, C), p["w"], p["b"],
                         act=act, n_out=p["n"]).reshape(B, HW, p["n"])
        return out, H, W
    Ho = (H + 2 - 3) // stride + 1
    Wo = (W + 2 - 3) // stride + 1
    out = _conv3x3_fn(x, p["w"], p["b"], H=H, W=W, stride=stride,
                      act=act, n_out=p["n"])
    return out, Ho, Wo


# ----------------------------------------------------------------------------
# attention / normalization wrappers
# ----------------------------------------------------------------------------
def _pick_kv_block(Sk):
    if Sk <= 1024:
        return Sk
    best = None
    t = 16
    while t <= 512:
        if Sk % t == 0:
            best = t
        t += 16
    return best if best is not None else Sk


def _pick_hb(heads, d, sq, skb, budget):
    cands = [h for h in range(heads, 0, -1)
             if heads % h == 0 and (((h * d) % 128 == 0) or h == heads)]
    for h in cands:
        hd = h * d
        est = (4 * sq * hd        # q blocks (bf16, double-buffered)
               + 8 * skb * hd     # k + v blocks
               + 4 * sq * hd      # out blocks
               + 4 * sq * hd      # acc scratch f32
               + 4 * sq * skb     # per-head score tensor f32
               + 16 * sq)         # m / l scratch
        if est <= budget:
            return h
    return cands[-1]


@functools.partial(jax.jit, static_argnames=("heads", "head_dim"))
def attention(q, k, v, *, heads, head_dim):
    # q: [B, Sq, heads*head_dim], k/v: [B, Sk, heads*head_dim] (channels-last,
    # no host-side head split); returns the same layout, bf16.
    q = q.astype(jnp.bfloat16)
    k = k.astype(jnp.bfloat16)
    v = v.astype(jnp.bfloat16)
    B, Sq, HD = q.shape
    Sk = k.shape[1]
    skb = _pick_kv_block(Sk)
    nkv = Sk // skb
    hb = _pick_hb(heads, head_dim, Sq, skb, VMEM_LIMIT // 2)
    hbd = hb * head_dim
    G = heads // hb
    scale = 1.0 / math.sqrt(head_dim)
    return pl.pallas_call(
        functools.partial(_attn_kernel, hb=hb, d=head_dim, scale=scale),
        grid=(B, G, nkv),
        in_specs=[
            pl.BlockSpec((1, Sq, hbd), lambda b, g, kv: (b, 0, g)),
            pl.BlockSpec((1, skb, hbd), lambda b, g, kv: (b, kv, g)),
            pl.BlockSpec((1, skb, hbd), lambda b, g, kv: (b, kv, g)),
        ],
        out_specs=pl.BlockSpec((1, Sq, hbd), lambda b, g, kv: (b, 0, g)),
        out_shape=jax.ShapeDtypeStruct((B, Sq, HD), jnp.bfloat16),
        scratch_shapes=[pltpu.VMEM((Sq, hb), jnp.float32),
                        pltpu.VMEM((Sq, hb), jnp.float32),
                        pltpu.VMEM((Sq, hbd), jnp.float32)],
        compiler_params=pltpu.CompilerParams(
            dimension_semantics=("parallel", "parallel", "arbitrary"),
            vmem_limit_bytes=VMEM_LIMIT),
    )(q, k, v)


@jax.jit
def _layernorm_fn(x2, g, b):
    M, D = x2.shape
    Mp = _round_up(M, 16)
    if Mp != M:
        x2 = jnp.pad(x2, ((0, Mp - M), (0, 0)))
    tm = _pick_tile(Mp, 16, 512)
    out = pl.pallas_call(
        functools.partial(_layernorm_kernel, eps=1e-5),
        grid=(Mp // tm,),
        in_specs=[pl.BlockSpec((tm, D), lambda i: (i, 0)),
                  pl.BlockSpec((1, D), lambda i: (0, 0)),
                  pl.BlockSpec((1, D), lambda i: (0, 0))],
        out_specs=pl.BlockSpec((tm, D), lambda i: (i, 0)),
        out_shape=jax.ShapeDtypeStruct((Mp, D), jnp.bfloat16),
        compiler_params=pltpu.CompilerParams(
            dimension_semantics=("parallel",),
            vmem_limit_bytes=VMEM_LIMIT),
    )(x2, g, b)
    if Mp != M:
        out = out[:M]
    return out


def layer_norm(x, p):
    lead = x.shape[:-1]
    D = x.shape[-1]
    out = _layernorm_fn(x.reshape(-1, D), p["g"].reshape(1, D), p["b"].reshape(1, D))
    return out.reshape(*lead, D)


def _pick_hw_block(HW):
    if HW <= 1024:
        return HW
    best = None
    t = 16
    while t <= 1024:
        if HW % t == 0:
            best = t
        t += 16
    return best if best is not None else HW


@functools.partial(jax.jit, static_argnames=("silu",))
def group_norm(x, g, b, silu=False):
    # x: [B, HW, C]; torch GroupNorm(32, C, eps=1e-5) semantics, optional SiLU.
    B, HW, C = x.shape
    hwb = _pick_hw_block(HW)
    nblk = HW // hwb
    stats = pl.pallas_call(
        functools.partial(_gn_stats_kernel, groups=32, eps=1e-5, hw_total=HW),
        grid=(B, nblk),
        in_specs=[pl.BlockSpec((1, hwb, C), lambda i, j: (i, j, 0))],
        out_specs=pl.BlockSpec((1, 8, C), lambda i, j: (i, 0, 0)),
        out_shape=jax.ShapeDtypeStruct((B, 8, C), jnp.float32),
        compiler_params=pltpu.CompilerParams(
            dimension_semantics=("parallel", "arbitrary"),
            vmem_limit_bytes=VMEM_LIMIT),
    )(x)
    out = pl.pallas_call(
        functools.partial(_gn_apply_kernel, silu=silu),
        grid=(B, nblk),
        in_specs=[pl.BlockSpec((1, hwb, C), lambda i, j: (i, j, 0)),
                  pl.BlockSpec((1, 8, C), lambda i, j: (i, 0, 0)),
                  pl.BlockSpec((1, C), lambda i, j: (0, 0)),
                  pl.BlockSpec((1, C), lambda i, j: (0, 0))],
        out_specs=pl.BlockSpec((1, hwb, C), lambda i, j: (i, j, 0)),
        out_shape=jax.ShapeDtypeStruct((B, HW, C), jnp.bfloat16),
        compiler_params=pltpu.CompilerParams(
            dimension_semantics=("parallel", "parallel"),
            vmem_limit_bytes=VMEM_LIMIT),
    )(x, stats, g.reshape(1, C), b.reshape(1, C))
    return out


@functools.partial(jax.jit, static_argnames=("act",))
def eltwise(x, act):
    return pl.pallas_call(
        functools.partial(_eltwise_kernel, act=act),
        out_shape=jax.ShapeDtypeStruct(x.shape, jnp.bfloat16))(x)


# ----------------------------------------------------------------------------
# parameter construction (deterministic synthetic init; weights pre-transposed
# to [K, N], pre-padded and stored bf16 once at init)
# ----------------------------------------------------------------------------
STD = 0.02


class KeyGen:
    def __init__(self, seed):
        self.base = jax.random.PRNGKey(seed)
        self.n = 0

    def __call__(self):
        self.n += 1
        return jax.random.fold_in(self.base, self.n)


def _prep(w_kn, b_n):
    # w_kn: [K, N] f32 -> packed bf16 [Kp, Np]; bias -> padded f32 [1, Np].
    K, N = w_kn.shape
    Kp = _round_up(K, 16)
    Np = _round_up(N, 128)
    w = jnp.pad(w_kn, ((0, Kp - K), (0, Np - N))).astype(jnp.bfloat16)
    if b_n is None:
        bias = jnp.zeros((1, Np), jnp.float32)
    else:
        bias = jnp.pad(b_n.reshape(1, N), ((0, 0), (0, Np - N))).astype(jnp.float32)
    return {"w": w, "b": bias, "n": N}


def dense_p(kg, out_f, in_f, bias=True):
    w = jax.random.normal(kg(), (out_f, in_f), jnp.float32) * STD
    b = jnp.zeros((out_f,), jnp.float32) if bias else None
    return _prep(w.T, b)


def conv_p(kg, cout, cin, k, stride=1, act="none"):
    w = jax.random.normal(kg(), (cout, cin, k, k), jnp.float32) * STD
    wm = jnp.transpose(w, (2, 3, 1, 0)).reshape(k * k * cin, cout)   # (i, j, cin) major
    p = _prep(wm, jnp.zeros((cout,), jnp.float32))
    p["ksize"] = k
    p["stride"] = stride
    p["act"] = act
    return p


def norm_p(c):
    return {"g": jnp.ones((c,), jnp.float32), "b": jnp.zeros((c,), jnp.float32)}


def init_resnet(kg, cin, cout, temb=1280):
    p = {"type": "resnet",
         "norm1": norm_p(cin), "conv1": conv_p(kg, cout, cin, 3),
         "time": dense_p(kg, cout, temb),
         "norm2": norm_p(cout), "conv2": conv_p(kg, cout, cout, 3)}
    if cin != cout:
        p["shortcut"] = conv_p(kg, cout, cin, 1)
    return p


def init_attn_block(kg, heads, head_dim, channels, num_layers, cross_dim=2048):
    inner = heads * head_dim
    layers = []
    for _ in range(num_layers):
        layers.append({
            "norm1": norm_p(inner),
            "attn1": {"q": dense_p(kg, inner, inner, bias=False),
                      "k": dense_p(kg, inner, inner, bias=False),
                      "v": dense_p(kg, inner, inner, bias=False),
                      "o": dense_p(kg, inner, inner)},
            "norm2": norm_p(inner),
            "attn2": {"q": dense_p(kg, inner, inner, bias=False),
                      "k": dense_p(kg, inner, cross_dim, bias=False),
                      "v": dense_p(kg, inner, cross_dim, bias=False),
                      "o": dense_p(kg, inner, inner)},
            "norm3": norm_p(inner),
            "geglu_a": dense_p(kg, inner * 4, inner),   # GEGLU value projection
            "geglu_g": dense_p(kg, inner * 4, inner),   # GEGLU gate projection
            "ff": dense_p(kg, inner, inner * 4),
        })
    return {"type": "attn", "heads": heads, "head_dim": head_dim,
            "norm": norm_p(channels), "proj_in": dense_p(kg, inner, channels),
            "layers": layers, "proj_out": dense_p(kg, channels, inner)}


def init_controlnet_conv_in(kg):
    chans = (3, 16, 32, 96, 256, 320)
    layers = [conv_p(kg, chans[1], chans[0], 3, stride=1, act="silu")]
    for i in range(1, len(chans) - 2):
        layers.append(conv_p(kg, chans[i], chans[i], 3, stride=1, act="silu"))
        layers.append(conv_p(kg, chans[i + 1], chans[i], 3, stride=2, act="silu"))
    layers.append(conv_p(kg, chans[-1], chans[-2], 3, stride=1, act="none"))
    return layers


def init_clip_block(kg, d=320):
    # ResidualAttentionBlock(320, 8) with torch.nn.MultiheadAttention weights
    w_in = jax.random.normal(kg(), (3 * d, d), jnp.float32) * STD
    return {"in_proj": _prep(w_in.T, jnp.zeros((3 * d,), jnp.float32)),
            "out_proj": dense_p(kg, d, d),
            "ln_1": norm_p(d), "ln_2": norm_p(d),
            "c_fc": dense_p(kg, 4 * d, d), "c_proj": dense_p(kg, d, 4 * d)}


BLOCK_DEFS = [
    ("resnet", 320, 320), ("push",), ("resnet", 320, 320), ("push",),
    ("down", 320), ("push",),
    ("resnet", 320, 640), ("attn", 10, 64, 640, 2), ("push",),
    ("resnet", 640, 640), ("attn", 10, 64, 640, 2), ("push",),
    ("down", 640), ("push",),
    ("resnet", 640, 1280), ("attn", 20, 64, 1280, 10), ("push",),
    ("resnet", 1280, 1280), ("attn", 20, 64, 1280, 10), ("push",),
    ("resnet", 1280, 1280), ("attn", 20, 64, 1280, 10),
    ("resnet", 1280, 1280), ("push",),
]


def init_params(seed=42):
    kg = KeyGen(seed)
    p = {}
    p["time_embedding"] = [dense_p(kg, 1280, 320), dense_p(kg, 1280, 1280)]
    p["add_time_embedding"] = [dense_p(kg, 1280, 2816), dense_p(kg, 1280, 1280)]
    p["control_type_embedding"] = [dense_p(kg, 1280, 2048), dense_p(kg, 1280, 1280)]
    p["conv_in"] = conv_p(kg, 320, 4, 3)
    p["controlnet_conv_in"] = init_controlnet_conv_in(kg)
    p["controlnet_transformer"] = init_clip_block(kg, 320)
    p["task_embedding"] = jax.random.normal(kg(), (8, 320), jnp.float32)
    p["spatial_ch_projs"] = dense_p(kg, 320, 320)
    blocks = []
    for spec in BLOCK_DEFS:
        if spec[0] == "resnet":
            blocks.append(init_resnet(kg, spec[1], spec[2]))
        elif spec[0] == "attn":
            blocks.append(init_attn_block(kg, spec[1], spec[2], spec[3], spec[4]))
        elif spec[0] == "down":
            blocks.append({"type": "down", "conv": conv_p(kg, spec[1], spec[1], 3, stride=2)})
        else:
            blocks.append({"type": "push"})
    p["blocks"] = blocks
    cb_channels = [320, 320, 320, 320, 640, 640, 640, 1280, 1280, 1280]
    p["controlnet_blocks"] = [conv_p(kg, c, c, 1) for c in cb_channels]
    return p


# ----------------------------------------------------------------------------
# forward pass
# ----------------------------------------------------------------------------
TASK_ID = {"openpose": 0, "depth": 1, "softedge": 2, "canny": 3, "lineart": 3,
           "lineart_anime": 3, "tile": 6, "inpaint": 7}


def timesteps_proj(t, num_channels):
    half = num_channels // 2
    exponent = -math.log(10000.0) * jnp.arange(half, dtype=jnp.float32) / half
    freqs = jnp.exp(exponent)
    emb = t.astype(jnp.float32)[:, None] * freqs[None, :]
    return jnp.concatenate([jnp.cos(emb), jnp.sin(emb)], axis=-1)


def mlp_embed(x, layers):                      # Linear -> SiLU -> Linear
    x = linear(x, layers[0], act="silu")
    return linear(x, layers[1])


def attn_layer(p, xq, xkv, heads, head_dim):
    q = linear(xq, p["q"])                     # [B, Sq, heads*head_dim]
    k = linear(xkv, p["k"])
    v = linear(xkv, p["v"])
    o = attention(q, k, v, heads=heads, head_dim=head_dim)
    return linear(o, p["o"])


def basic_transformer_block(x, text, p, heads, head_dim):
    n = layer_norm(x, p["norm1"])
    x = x + attn_layer(p["attn1"], n, n, heads, head_dim)
    n = layer_norm(x, p["norm2"])
    x = x + attn_layer(p["attn2"], n, text, heads, head_dim)
    n = layer_norm(x, p["norm3"])
    a = linear(n, p["geglu_a"])                      # GEGLU value half
    g = linear(n, p["geglu_g"], act="gelu")          # GEGLU gate half (gelu fused)
    h = gated_linear(a, g, p["ff"])                  # (a * gelu(g)) @ W_ff fused
    return x + h


def attention_block(x, text, p):
    residual = x
    h = group_norm(x, p["norm"]["g"], p["norm"]["b"], silu=False)
    h = linear(h, p["proj_in"])
    for lp in p["layers"]:
        h = basic_transformer_block(h, text, lp, p["heads"], p["head_dim"])
    h = linear(h, p["proj_out"])
    return h + residual


def resnet_block(x, H, W, silu_time_emb, p):
    h = group_norm(x, p["norm1"]["g"], p["norm1"]["b"], silu=True)
    h, _, _ = conv2d(h, p["conv1"], H, W)
    emb = linear(silu_time_emb, p["time"])
    h = h + emb[:, None, :]
    h = group_norm(h, p["norm2"]["g"], p["norm2"]["b"], silu=True)
    h, _, _ = conv2d(h, p["conv2"], H, W)
    if "shortcut" in p:
        x, _, _ = conv2d(x, p["shortcut"], H, W)
    return x + h


def residual_attention_block(x, p):
    # x: [L, N, E]; torch.nn.MultiheadAttention (batch_first=False) attends
    # over axis 0 (here L == batch of the stacked [feat_seq, mean(hidden)]).
    L, N, E = x.shape
    heads, head_dim = 8, E // 8
    h = layer_norm(x, p["ln_1"])
    qkv = linear(h.reshape(L * N, E), p["in_proj"])
    q, k, v = qkv[:, :E], qkv[:, E:2 * E], qkv[:, 2 * E:]

    def to_bse(t):
        return t.reshape(L, N, E).transpose(1, 0, 2)     # [N, L, E]

    o = attention(to_bse(q), to_bse(k), to_bse(v), heads=heads, head_dim=head_dim)
    o = o.transpose(1, 0, 2).reshape(L * N, E)
    o = linear(o, p["out_proj"]).reshape(L, N, E)
    x = x + o
    h = layer_norm(x, p["ln_2"])
    h = linear(h, p["c_fc"], act="quick_gelu")
    h = linear(h, p["c_proj"])
    return x + h


def fuse_condition_to_input(p, hidden, task_id, conditioning):
    B, Cc, Hc, Wc = conditioning.shape
    c = conditioning.transpose(0, 2, 3, 1).reshape(B, Hc * Wc, Cc).astype(jnp.bfloat16)
    h, w = Hc, Wc
    for layer in p["controlnet_conv_in"]:
        c, h, w = conv2d(c, layer, h, w, act=layer["act"])
    controlnet_cond = c                                          # [B, H*W, 320] bf16
    feat_seq = jnp.mean(controlnet_cond.astype(jnp.float32), axis=1) + p["task_embedding"][task_id]
    x = jnp.stack([feat_seq, jnp.mean(hidden.astype(jnp.float32), axis=1)], axis=1)
    x = residual_attention_block(x, p["controlnet_transformer"])
    alpha = linear(x[:, 0], p["spatial_ch_projs"])
    controlnet_cond_fuser = controlnet_cond + alpha[:, None, :]
    return hidden + controlnet_cond_fuser


def sdxl_controlnet_union_forward(p, sample, timestep, encoder_hidden_states,
                                  conditioning, processor_id, add_time_id,
                                  add_text_embeds, global_pool=False):
    task_id = TASK_ID[processor_id]
    t_emb = mlp_embed(timesteps_proj(timestep, 320), p["time_embedding"])
    time_embeds = timesteps_proj(add_time_id, 256).reshape(add_text_embeds.shape[0], -1)
    add_embeds = jnp.concatenate([add_text_embeds, time_embeds], axis=-1)
    add_embeds = mlp_embed(add_embeds, p["add_time_embedding"])
    B = sample.shape[0]
    control_type = jnp.zeros((B, 8), jnp.float32).at[:, task_id].set(1.0)
    control_embeds = timesteps_proj(control_type.reshape(-1), 256).reshape(B, -1)
    control_embeds = mlp_embed(control_embeds, p["control_type_embedding"])
    time_emb = t_emb + add_embeds + control_embeds

    _, _, H, W = sample.shape
    x = sample.transpose(0, 2, 3, 1).reshape(B, H * W, sample.shape[1]).astype(jnp.bfloat16)
    x, _, _ = conv2d(x, p["conv_in"], H, W)
    x = fuse_condition_to_input(p, x, task_id, conditioning)
    text_emb = encoder_hidden_states.astype(jnp.bfloat16)
    silu_time_emb = eltwise(time_emb, "silu")

    res_stack = [(x, H, W)]
    h, w = H, W
    for blk in p["blocks"]:
        if blk["type"] == "resnet":
            x = resnet_block(x, h, w, silu_time_emb, blk)
        elif blk["type"] == "attn":
            x = attention_block(x, text_emb, blk)
        elif blk["type"] == "down":
            x, h, w = conv2d(x, blk["conv"], h, w)
        else:                                                    # PushBlock
            res_stack.append((x, h, w))

    outs = []
    for cb, (res, rh, rw) in zip(p["controlnet_blocks"], res_stack):
        y, _, _ = conv2d(res, cb, rh, rw)                        # 1x1 conv
        y = y.reshape(B, rh, rw, -1).transpose(0, 3, 1, 2).astype(jnp.float32)  # NCHW
        if global_pool:
            y = jnp.mean(y, axis=(2, 3), keepdims=True)
        outs.append(y)
    return outs


# ----------------------------------------------------------------------------
# main
# ----------------------------------------------------------------------------
if __name__ == "__main__":
    B, H, W = 2, 16, 16                              # latent 16x16, image 128x128
    key = jax.random.PRNGKey(0)
    k1, k2, k3, k4 = jax.random.split(key, 4)
    sample = jax.random.normal(k1, (B, 4, H, W), jnp.float32)
    timestep = jnp.array([500.0], jnp.float32)
    encoder_hidden_states = jax.random.normal(k2, (B, 8, 2048), jnp.float32)
    conditioning = jax.random.normal(k3, (B, 3, H * 8, W * 8), jnp.float32)
    add_time_id = jnp.tile(jnp.array([H * 8, W * 8, 0, 0, H * 8, W * 8], jnp.float32), B)
    add_text_embeds = jax.random.normal(k4, (B, 1280), jnp.float32)

    params = init_params(seed=42)
    outs = sdxl_controlnet_union_forward(
        params, sample, timestep, encoder_hidden_states, conditioning,
        "canny", add_time_id, add_text_embeds)
    outs = [jax.block_until_ready(o) for o in outs]

    expected = ([(B, 320, 16, 16)] * 3 + [(B, 320, 8, 8)] + [(B, 640, 8, 8)] * 2 +
                [(B, 640, 4, 4)] + [(B, 1280, 4, 4)] * 3)
    assert [tuple(o.shape) for o in outs] == expected, [o.shape for o in outs]
    assert all(bool(jnp.all(jnp.isfinite(o))) for o in outs)
    print("KERNEL_OK")
</pallas_src>

<mosaic_0001>
module attributes {stable_mosaic.version = 11 : i64} {
  func.func @_matmul_kernel(%arg0: i32, %arg1: i32, %arg2: i32, %arg3: memref<16x320xbf16, #tpu.memory_space<vmem>>, %arg4: memref<320x640xbf16, #tpu.memory_space<vmem>>, %arg5: memref<1x640xf32, #tpu.memory_space<vmem>>, %arg6: memref<16x640xbf16, #tpu.memory_space<vmem>>, %arg7: memref<16x640xf32, #tpu.memory_space<vmem>>) attributes {dimension_semantics = [#tpu.dimension_semantics<parallel>, #tpu.dimension_semantics<parallel>, #tpu.dimension_semantics<arbitrary>], iteration_bounds = array<i64: 1, 2, 1>, scalar_prefetch = 0 : i64, scratch_operands = 1 : i64, tpu.core_type = #tpu.core_type<tc>, window_params = [{transform_indices = @transform_0, window_bounds = array<i64: 16, 320>}, {transform_indices = @transform_1, window_bounds = array<i64: 320, 640>}, {transform_indices = @transform_2, window_bounds = array<i64: 1, 640>}, {transform_indices = @transform_3, window_bounds = array<i64: 16, 640>}]} {
    %c0_i32 = arith.constant 0 : i32
    %0 = arith.cmpi eq, %arg2, %c0_i32 : i32
    %1 = arith.extui %0 : i1 to i32
    %c0_i32_0 = arith.constant 0 : i32
    %2 = arith.cmpi ne, %1, %c0_i32_0 : i32
    scf.if %2 {
      %cst_10 = arith.constant 0.000000e+00 : f32
      %12 = vector.broadcast %cst_10 : f32 to vector<16x640xf32>
      %c0_11 = arith.constant 0 : index
      %c0_12 = arith.constant 0 : index
      %13 = vector.load %arg7[%c0_11, %c0_12] : memref<16x640xf32, #tpu.memory_space<vmem>>, vector<16x640xf32>
      tpu.vector_store %arg7[%c0_11, %c0_12], %12 {strides = array<i32>} : memref<16x640xf32, #tpu.memory_space<vmem>>, vector<16x640xf32>,
    } else {
    }
    %c0 = arith.constant 0 : index
    %c0_1 = arith.constant 0 : index
    %3 = vector.load %arg7[%c0, %c0_1] : memref<16x640xf32, #tpu.memory_space<vmem>>, vector<16x640xf32>
    %c0_2 = arith.constant 0 : index
    %c0_3 = arith.constant 0 : index
    %4 = vector.load %arg3[%c0_2, %c0_3] : memref<16x320xbf16, #tpu.memory_space<vmem>>, vector<16x320xbf16>
    %c0_4 = arith.constant 0 : index
    %c0_5 = arith.constant 0 : index
    %5 = vector.load %arg4[%c0_4, %c0_5] : memref<320x640xbf16, #tpu.memory_space<vmem>>, vector<320x640xbf16>
    %cst = arith.constant dense<0.000000e+00> : vector<16x640xf32>
    %6 = tpu.matmul %4, %5, %cst {dimension_numbers = #tpu.dot_dimension_numbers<[1], [0], [0], [1], [0, 0, 1, 1], [], []>} : vector<16x320xbf16>, vector<320x640xbf16>, vector<16x640xf32> -> vector<16x640xf32>
    %7 = arith.addf %3, %6 : vector<16x640xf32>
    %c0_6 = arith.constant 0 : index
    %c0_7 = arith.constant 0 : index
    %8 = vector.load %arg7[%c0_6, %c0_7] : memref<16x640xf32, #tpu.memory_space<vmem>>, vector<16x640xf32>
    tpu.vector_store %arg7[%c0_6, %c0_7], %7 {strides = array<i32>} : memref<16x640xf32, #tpu.memory_space<vmem>>, vector<16x640xf32>,
    %c0_i32_8 = arith.constant 0 : i32
    %9 = arith.cmpi eq, %arg2, %c0_i32_8 : i32
    %10 = arith.extui %9 : i1 to i32
    %c0_i32_9 = arith.constant 0 : i32
    %11 = arith.cmpi ne, %10, %c0_i32_9 : i32
    scf.if %11 {
      %c0_10 = arith.constant 0 : index
      %c0_11 = arith.constant 0 : index
      %12 = vector.load %arg7[%c0_10, %c0_11] : memref<16x640xf32, #tpu.memory_space<vmem>>, vector<16x640xf32>
      %c0_12 = arith.constant 0 : index
      %c0_13 = arith.constant 0 : index
      %13 = vector.load %arg5[%c0_12, %c0_13] : memref<1x640xf32, #tpu.memory_space<vmem>>, vector<1x640xf32>
      %14 = vector.broadcast %13 : vector<1x640xf32> to vector<16x640xf32>
      %15 = arith.addf %12, %14 : vector<16x640xf32>
      %cst_14 = arith.constant 0.000000e+00 : f32
      %16 = vector.broadcast %cst_14 : f32 to vector<16x640xf32>
      %17 = arith.subf %16, %15 : vector<16x640xf32>
      %18 = math.exp %17 : vector<16x640xf32>
      %cst_15 = arith.constant 1.000000e+00 : f32
      %19 = vector.broadcast %cst_15 : f32 to vector<16x640xf32>
      %20 = arith.addf %19, %18 : vector<16x640xf32>
      %cst_16 = arith.constant 1.000000e+00 : f32
      %21 = vector.broadcast %cst_16 : f32 to vector<16x640xf32>
      %22 = arith.divf %21, %20 : vector<16x640xf32>
      %23 = arith.mulf %15, %22 : vector<16x640xf32>
      %24 = arith.truncf %23 : vector<16x640xf32> to vector<16x640xbf16>
      %c0_17 = arith.constant 0 : index
      %c0_18 = arith.constant 0 : index
      %25 = vector.load %arg6[%c0_17, %c0_18] : memref<16x640xbf16, #tpu.memory_space<vmem>>, vector<16x640xbf16>
      tpu.vector_store %arg6[%c0_17, %c0_18], %24 {strides = array<i32>} : memref<16x640xbf16, #tpu.memory_space<vmem>>, vector<16x640xbf16>,
    } else {
    }
    return
  }
  func.func @transform_0(%arg0: i32, %arg1: i32, %arg2: i32) -> (i32, i32) {
    %c0_i32 = arith.constant 0 : i32
    return %arg0, %arg2 : i32, i32
  }
  func.func @transform_1(%arg0: i32, %arg1: i32, %arg2: i32) -> (i32, i32) {
    %c0_i32 = arith.constant 0 : i32
    return %arg2, %arg1 : i32, i32
  }
  func.func @transform_2(%arg0: i32, %arg1: i32, %arg2: i32) -> (i32, i32) {
    %c0_i32 = arith.constant 0 : i32
    %c0_i32_0 = arith.constant 0 : i32
    return %c0_i32, %arg1 : i32, i32
  }
  func.func @transform_3(%arg0: i32, %arg1: i32, %arg2: i32) -> (i32, i32) {
    %c0_i32 = arith.constant 0 : i32
    return %arg0, %arg1 : i32, i32
  }
}

</mosaic_0001>

<bundles_post_ra>
// kernel: _linear_fn.1
= control target key start
LH: loop header
LB: loop body
LE: loop exit
PB: predicated region body
PF: predicated region fallthrough
CT: control target
= control target key end

     0   :  { %8 = vsyncpa [#allocation4], 0  ;;  %s2419_s0 = inlined_call_operand.vmem [shape: bf16[16,320], index: 0, kind: input, shape index: {}]   ;;  %s2420_s1 = inlined_call_operand.hbm [shape: bf16[320,1280], index: 1, kind: input, shape index: {}]   ;;  %s2421_s2 = inlined_call_operand.vmem [shape: f32[1,1280], index: 2, kind: input, shape index: {}]   ;;  %s2422_s3 = inlined_call_operand.vmem [shape: bf16[16,1280], index: 3, kind: output, shape index: {}]  }
   0x1   :  { %10 = vsyncpa [#allocation4 + $0x1], 0  ;;  %s2095_s12 = smov 0   ;;  %s2097_s13 = smov 0  }
   0x2   :  { %s2099_s14 = smov 0   ;;  %s2101_s15 = smov 0  }
   0x3   :  { %s2103_s16 = smov 0   ;;  %s2105_s17 = smov 0  }
   0x4 LB: > { %s1557_s18 = sadd.s32 4294967295, %s2066_s17   ;;  %s31_s19 = sadd.s32 1, %s2062_s16  ;;  %s2066_s17 = sphi %s2105_s17, %s16_s17   ;;  %s2062_s16 = sphi %s2103_s16, %s2433_s16   ;;  %s2058_s15 = sphi %s2101_s15, %s2432_s15   ;;  %s2054_s14 = sphi %s2099_s14, %s2431_s14   ;;  %s2050_s13 = sphi %s2097_s13, %s2430_s13   ;;  %s2046_s12 = sphi %s2095_s12, %s2429_s12  }
   0x5   : > { %p33_p0 = scmp.ge.s32.totalorder %s31_s19, 2  ;;  %s72_s20 = sadd.s32 1, %s2054_s14 }
   0x6   : > { %p79_p1 = scmp.ne.s32.totalorder %s2054_s14, %s2050_s13  ;;  %p80_p2 = scmp.eq.s32.totalorder %s2066_s17, 0 }
   0x7   : > { %s2435_s19 = smov (%p33_p0, %s31_s19), 0  ;;  %p85_p4 = scmp.ne.s32.totalorder %s2050_s13, %s2046_s12 }
   0x8   : > { %p2131_p3 = por %p80_p2, %p79_p1  ;;  %s68_s22 = ssub.s32 %s2062_s16, %s2435_s19 }
   0x9   : > { %p86_p5 = scmp.eq.s32.totalorder %s1557_s18, 0  ;;  %p70_p6 = scmp.eq.s32.totalorder %s68_s22, 0 }
   0xa   : > { %p137_p7 = scmp.eq.s32.totalorder %s1557_s18, 1  ;;  %p1747_p10 = scmp.lt.s32.totalorder %s2066_s17, 2 }
   0xb   : > { %p2138_p8 = por %p86_p5, %p85_p4  ;;  %s178_s26 = sand.u32 1, %s2054_s14  }
   0xc   : > { %s2143_s24 = scalar_select %p70_p6, %s2054_s14, %s72_s20  }
   0xd   : > { %p2145_p9 = por %p137_p7, %p79_p1  ;;  %s1683_s27 = smul.u32 320, %s2062_s16 }
   0xe   : > { %s1738_s28 = smul.u32 800, %s178_s26  ;;  %p2159_p11 = pnand %p1747_p10, %p2131_p3 }
   0xf   : > { %s2425_s25 = scalar_select %p2145_p9, 1, 0 }
  0x10   : > { %s2155_s4 = scalar_lea.hbm %s2420_s1, %s1683_s27  ;;  %s182_s6 = scalar_lea.vmem [#allocation3], %s1738_s28 }
  0x11   : > { %s192_s7 = sshll.u32 %s182_s6, 4  ;;  %s2166_s8 = scalar_lea.sflag [#allocation4], %s178_s26  ;;  %s2163_s7 = int_to_ptr.vmem [resolvable:$true] %s192_s7 }
  0x12   : > { %s1986_s9 = scalar_lea.hbm %s2155_s4, 12800  ;;  %p1988_p0 = pneg %p2159_p11 }
  0x13   : > { %p1987_p13 = scmp.ne.s32.totalorder %s2155_s4, %s1986_s9  ;;  %s1991_s12 = scalar_lea.hbm %s2420_s1, 25600 }
  0x14   : > { %p1992_p3 = scmp.lt.u32.totalorder %s2155_s4, %s2420_s1  ;;  %p1993_p4 = scmp.lt.u32.totalorder %s1991_s12, %s1986_s9 }
  0x15   : > { %p1989_p1 = pnand %p1988_p0, %p1987_p13  ;;  %p1995_p6 = scmp.lt.u32.totalorder %s1986_s9, %s2155_s4 }
  0x16   : > { %p1994_p5 = por %p1993_p4, %p1992_p3 }
  0x17   : > { %p1990_p2 = pneg %p1989_p1 }
  0x18   : > { %p1996_p7 = por %p1995_p6, %p1994_p5 }
  0x1a   : > { %p1997_p10 = pnand %p1996_p7, %p1990_p2 }
  0x1c   : > { %2000 = shalt.err (!%p1997_p10)
}
  0x1d   : > { %s2001_s21 = scalar_lea.vmem %s2163_s7, 12800  ;;  %s2068_s22 = smov [#allocation3]  }
  0x1e   : > { %p2002_p13 = scmp.ne.s32.totalorder %s2163_s7, %s2001_s21  ;;  %s2006_s26 = sshll.u32 %s2068_s22, 4  ;;  %s2007_s26 = int_to_ptr.vmem [resolvable:$false] %s2006_s26 }
  0x1f   : > { %s2008_s27 = scalar_lea.vmem %s2007_s26, 25600  ;;  %p2009_p9 = scmp.lt.s32.totalorder %s2163_s7, %s2007_s26 }
  0x20   : > { %p2004_p1 = pnand %p2002_p13, %p1988_p0  ;;  %p2010_p3 = scmp.lt.s32.totalorder %s2008_s27, %s2001_s21 }
  0x22   : > { %p2005_p12 = pneg %p2004_p1  ;;  %p2011_p4 = por %p2010_p3, %p2009_p9 }
  0x24   : > { %p2012_p5 = pnand %p2011_p4, %p2005_p12 }
  0x26   : > { %2015 = shalt.err (!%p2012_p5)
}
  0x27   : > { %s2069_s28 = smov 640   ;;  %s2070_s29 = smov 320  }
  0x28   : > { %s2071_s30 = smov 20   ;;  %p208_p0 = scmp.lt.s32.totalorder %s2066_s17, 3 }
  0x29   : > { %1746 = dma.hbm_to_vmem [thread:$0]  (!%p2159_p11), %s2155_s4, 12800, %s2163_s7, %s2166_s8, %s2069_s28, %s2070_s29, %s2071_s30  }
  0x2a   : > { %p2427_p2 = scmp.ge.s32.totalorder %s2066_s17, 1 }
  0x2c   : > { %p209_p6 = pnand %p2427_p2, %p208_p0 }
  0x2d   : > { %s2198_s6 = sand.u32 (!%p209_p6), 1, %s2050_s13  }
  0x2e   : > { %212 = sbr.rel (%p209_p6) target bundleno = 429 (0x1ad), region = 32  ;;  %s215_s10 = scalar_lea.sflag (!%p209_p6), [#allocation4], %s2198_s6 }
  0x2f   : > { %s1739_s9 = smul.u32 (!%p209_p6), 800, %s2198_s6 }
  0x31   : > { %s2202_s11 = scalar_lea.vmem (!%p209_p6), [#allocation3], %s1739_s9 }
  0x35   : > { %2041 = dma.done.wait (%p2138_p8), %s215_s10, 12800  }
  0x36   : > { %2043 = vsyncadd (%p2138_p8), %s215_s10, 4294954496  ;;  %v1802_v0 = vld [vmem:[%s2202_s11 + $0x4] ss:$20 sps:$4 sm:$0xff]   ;;  %v1804_v1 = vld [vmem:[%s2202_s11 + $0xc] ss:$20 sps:$4 sm:$0xff]   ;;  %vm959_vm0 = vcmask 523264  }
  0x37   : > { %963 = vmatprep.subr.bf16.mxu0 %v1802_v0  ;;  %v1806_v2 = vld [vmem:[%s2202_s11] ss:$20 sps:$4 sm:$0xff]   ;;  %v1807_v3 = vld [vmem:[%s2202_s11 + $0x8] ss:$20 sps:$4 sm:$0xff]   ;;  %1049 = vmatprep.subr.bf16.mxu1 %v1804_v1  ;;  %v1813_v7 = vld [vmem:[%s2202_s11 + $0x30] ss:$20 sps:$4 sm:$0xff]  }
  0x38   : > { %v1808_v4 = vld [vmem:[%s2202_s11 + $0x2c] ss:$20 sps:$4 sm:$0xff]   ;;  %964 = vmatpush1.bf16.msra.mxu0 %v1806_v2  ;;  %1050 = vmatpush1.bf16.msra.mxu1 %v1807_v3  ;;  %v1810_v5 = vld [vmem:[%s2202_s11 + $0x34] ss:$20 sps:$4 sm:$0xff]   ;;  %v1816_v9 = vld [vmem:[%s2202_s11 + $0x5c] ss:$20 sps:$4 sm:$0xff]  }
  0x39   : > { %v1812_v6 = vld [vmem:[%s2202_s11 + $0x28] ss:$20 sps:$4 sm:$0xff]   ;;  %965 = vmatprep.subr.bf16.mxu0 %v1808_v4  ;;  %1051 = vmatprep.subr.bf16.mxu1 %v1810_v5  ;;  %v1818_v10 = vld [vmem:[%s2202_s11 + $0x50] ss:$20 sps:$4 sm:$0xff]   ;;  %v1819_v11 = vld [vmem:[%s2202_s11 + $0x58] ss:$20 sps:$4 sm:$0xff]  }
  0x3a   : > { %v1814_v8 = vld [vmem:[%s2202_s11 + $0x54] ss:$20 sps:$4 sm:$0xff]   ;;  %v1820_v12 = vld [vmem:[%s2202_s11 + $0x7c] ss:$20 sps:$4 sm:$0xff]   ;;  %v1822_v13 = vld [vmem:[%s2202_s11 + $0x84] ss:$20 sps:$4 sm:$0xff]  }
  0x3b   : > { %v1824_v14 = vld [vmem:[%s2202_s11 + $0x78] ss:$20 sps:$4 sm:$0xff]   ;;  %v1825_v15 = vld [vmem:[%s2202_s11 + $0x80] ss:$20 sps:$4 sm:$0xff]   ;;  %v1831_v19 = vld [vmem:[%s2202_s11 + $0xa8] ss:$20 sps:$4 sm:$0xff]  }
  0x3c   : > { %966 = vmatpush1.bf16.msra.mxu0 %v1812_v6  ;;  %1052 = vmatpush1.bf16.msra.mxu1 %v1813_v7  ;;  %v1826_v16 = vld [vmem:[%s2202_s11 + $0xa4] ss:$20 sps:$4 sm:$0xff]   ;;  %v1828_v17 = vld [vmem:[%s2202_s11 + $0xac] ss:$20 sps:$4 sm:$0xff]   ;;  %v1834_v21 = vld [vmem:[%s2202_s11 + $0xd4] ss:$20 sps:$4 sm:$0xff]  }
  0x3d   : > { %967 = vmatprep.subr.bf16.mxu0 %v1814_v8  ;;  %1053 = vmatprep.subr.bf16.mxu1 %v1816_v9  ;;  %v1830_v18 = vld [vmem:[%s2202_s11 + $0xa0] ss:$20 sps:$4 sm:$0xff]   ;;  %v1836_v22 = vld [vmem:[%s2202_s11 + $0xc8] ss:$20 sps:$4 sm:$0xff]   ;;  %v1837_v23 = vld [vmem:[%s2202_s11 + $0xd0] ss:$20 sps:$4 sm:$0xff]  }
  0x3e   : > { %v1832_v20 = vld [vmem:[%s2202_s11 + $0xcc] ss:$20 sps:$4 sm:$0xff]   ;;  %v1838_v24 = vld [vmem:[%s2202_s11 + $0xf4] ss:$20 sps:$4 sm:$0xff]   ;;  %v1840_v25 = vld [vmem:[%s2202_s11 + $0xfc] ss:$20 sps:$4 sm:$0xff]  }
  0x3f   : > { %v1842_v26 = vld [vmem:[%s2202_s11 + $0xf0] ss:$20 sps:$4 sm:$0xff]   ;;  %v1843_v27 = vld [vmem:[%s2202_s11 + $0xf8] ss:$20 sps:$4 sm:$0xff]   ;;  %v1849_v31 = vld [vmem:[%s2202_s11 + $0x120] ss:$20 sps:$4 sm:$0xff]  }
  0x40   : > { %968 = vmatpush1.bf16.msra.mxu0 %v1818_v10  ;;  %1054 = vmatpush1.bf16.msra.mxu1 %v1819_v11  ;;  %v1844_v28 = vld [vmem:[%s2202_s11 + $0x11c] ss:$20 sps:$4 sm:$0xff]   ;;  %v1846_v29 = vld [vmem:[%s2202_s11 + $0x124] ss:$20 sps:$4 sm:$0xff]   ;;  %v1852_v33 = vld [vmem:[%s2202_s11 + $0x14c] ss:$20 sps:$4 sm:$0xff]  }
  0x41   : > { %969 = vmatprep.subr.bf16.mxu0 %v1820_v12  ;;  %1055 = vmatprep.subr.bf16.mxu1 %v1822_v13  ;;  %v1848_v30 = vld [vmem:[%s2202_s11 + $0x118] ss:$20 sps:$4 sm:$0xff]   ;;  %v1854_v34 = vld [vmem:[%s2202_s11 + $0x140] ss:$20 sps:$4 sm:$0xff]   ;;  %v1855_v35 = vld [vmem:[%s2202_s11 + $0x148] ss:$20 sps:$4 sm:$0xff]  }
  0x42   : > { %v1850_v32 = vld [vmem:[%s2202_s11 + $0x144] ss:$20 sps:$4 sm:$0xff]   ;;  %v1856_v36 = vld [vmem:[%s2202_s11 + $0x16c] ss:$20 sps:$4 sm:$0xff]   ;;  %v1858_v37 = vld [vmem:[%s2202_s11 + $0x174] ss:$20 sps:$4 sm:$0xff]  }
  0x43   : > { %v1860_v38 = vld [vmem:[%s2202_s11 + $0x168] ss:$20 sps:$4 sm:$0xff]   ;;  %v1861_v39 = vld [vmem:[%s2202_s11 + $0x170] ss:$20 sps:$4 sm:$0xff]   ;;  %v1867_v43 = vld [vmem:[%s2202_s11 + $0x198] ss:$20 sps:$4 sm:$0xff]  }
  0x44   : > { %970 = vmatpush1.bf16.msra.mxu0 %v1824_v14  ;;  %1056 = vmatpush1.bf16.msra.mxu1 %v1825_v15  ;;  %v1862_v40 = vld [vmem:[%s2202_s11 + $0x194] ss:$20 sps:$4 sm:$0xff]   ;;  %v1864_v41 = vld [vmem:[%s2202_s11 + $0x19c] ss:$20 sps:$4 sm:$0xff]   ;;  %v1870_v45 = vld [vmem:[%s2202_s11 + $0x1c4] ss:$20 sps:$4 sm:$0xff]  }
  0x45   : > { %971 = vmatprep.subr.bf16.mxu0 %v1826_v16  ;;  %1057 = vmatprep.subr.bf16.mxu1 %v1828_v17  ;;  %v1866_v42 = vld [vmem:[%s2202_s11 + $0x190] ss:$20 sps:$4 sm:$0xff]   ;;  %v1872_v46 = vld [vmem:[%s2202_s11 + $0x1b8] ss:$20 sps:$4 sm:$0xff]   ;;  %v1873_v48 = vld [vmem:[%s2202_s11 + $0x1c0] ss:$20 sps:$4 sm:$0xff]  }
  0x46   : > { %v1868_v44 = vld [vmem:[%s2202_s11 + $0x1bc] ss:$20 sps:$4 sm:$0xff]   ;;  %v1874_v49 = vld [vmem:[%s2202_s11 + $0x1e4] ss:$20 sps:$4 sm:$0xff]   ;;  %v1876_v50 = vld [vmem:[%s2202_s11 + $0x1ec] ss:$20 sps:$4 sm:$0xff]  }
  0x47   : > { %v2258_v47 = vld [vmem:[%s2419_s0 + $0x4] ss:$12 sps:$4 sm:$0xff]   ;;  %v1878_v51 = vld [vmem:[%s2202_s11 + $0x1e0] ss:$20 sps:$4 sm:$0xff]   ;;  %v1879_v52 = vld [vmem:[%s2202_s11 + $0x1e8] ss:$20 sps:$4 sm:$0xff]  }
  0x48   : > { %972 = vmatpush1.bf16.msra.mxu0 %v1830_v18  ;;  %1058 = vmatpush1.bf16.msra.mxu1 %v1831_v19  ;;  %v1880_v53 = vld [vmem:[%s2202_s11 + $0x20c] ss:$20 sps:$4 sm:$0xff]   ;;  %v1882_v54 = vld [vmem:[%s2202_s11 + $0x214] ss:$20 sps:$4 sm:$0xff]   ;;  %v1885_v56 = vld [vmem:[%s2202_s11 + $0x210] ss:$20 sps:$4 sm:$0xff]  }
  0x49   : > { %973 = vmatprep.subr.bf16.mxu0 %v1832_v20  ;;  %1059 = vmatprep.subr.bf16.mxu1 %v1834_v21  ;;  %v1884_v55 = vld [vmem:[%s2202_s11 + $0x208] ss:$20 sps:$4 sm:$0xff]   ;;  %v1890_v59 = vld [vmem:[%s2202_s11 + $0x230] ss:$20 sps:$4 sm:$0xff]   ;;  %v1891_v60 = vld [vmem:[%s2202_s11 + $0x238] ss:$20 sps:$4 sm:$0xff]  }
  0x4a   : > { %995 = vmatprep.mubr.bf16.mxu0 %v2258_v47  ;;  %1081 = vmatprep.mubr.bf16.mxu1 %v2258_v47  ;;  %v1886_v57 = vld [vmem:[%s2202_s11 + $0x234] ss:$20 sps:$4 sm:$0xff]   ;;  %v1888_v58 = vld [vmem:[%s2202_s11 + $0x23c] ss:$20 sps:$4 sm:$0xff]   ;;  %v1894_v62 = vld [vmem:[%s2202_s11 + $0x264] ss:$20 sps:$4 sm:$0xff]  }
  0x4b   : > { %v1892_v61 = vld [vmem:[%s2202_s11 + $0x25c] ss:$20 sps:$4 sm:$0xff]   ;;  %v1896_v63 = vld [vmem:[%s2202_s11 + $0x258] ss:$20 sps:$4 sm:$0xff]   ;;  %v1897_v0 = vld [vmem:[%s2202_s11 + $0x260] ss:$20 sps:$4 sm:$0xff]  }
  0x4c   : > { %974 = vmatpush1.bf16.msra.mxu0 %v1836_v22  ;;  %1060 = vmatpush1.bf16.msra.mxu1 %v1837_v23  ;;  %v1902_v1 = vld [vmem:[%s2202_s11 + $0x284] ss:$20 sps:$4 sm:$0xff]   ;;  %v1905_v2 = vld [vmem:[%s2202_s11 + $0x28c] ss:$20 sps:$4 sm:$0xff]   ;;  %v1903_v4 = vld [vmem:[%s2202_s11 + $0x288] ss:$20 sps:$4 sm:$0xff]  }
  0x4d   : > { %975 = vmatprep.subr.bf16.mxu0 %v1838_v24  ;;  %1061 = vmatprep.subr.bf16.mxu1 %v1840_v25  ;;  %v1900_v3 = vld [vmem:[%s2202_s11 + $0x280] ss:$20 sps:$4 sm:$0xff]   ;;  %v1907_v8 = vld [vmem:[%s2202_s11 + $0x2a8] ss:$20 sps:$4 sm:$0xff]   ;;  %v1910_v9 = vld [vmem:[%s2202_s11 + $0x2b0] ss:$20 sps:$4 sm:$0xff]  }
  0x4e   : > { %v2286_v5 = vld [vmem:[%s2419_s0] ss:$12 sps:$4 sm:$0xff]   ;;  %v1912_v7 = vld [vmem:[%s2202_s11 + $0x2b4] ss:$20 sps:$4 sm:$0xff]   ;;  %v1918_v11 = vld [vmem:[%s2202_s11 + $0x2dc] ss:$20 sps:$4 sm:$0xff]  }
  0x4f   : > { %v1909_v6 = vld [vmem:[%s2202_s11 + $0x2ac] ss:$20 sps:$4 sm:$0xff]   ;;  %v1915_v10 = vld [vmem:[%s2202_s11 + $0x2d4] ss:$20 sps:$4 sm:$0xff]   ;;  %v1913_v12 = vld [vmem:[%s2202_s11 + $0x2d0] ss:$20 sps:$4 sm:$0xff]  }
  0x50   : > { %976 = vmatpush1.bf16.msra.mxu0 %v1842_v26  ;;  %1062 = vmatpush1.bf16.msra.mxu1 %v1843_v27  ;;  %v2072_v13 = vmov 0   ;;  %v1916_v14 = vld [vmem:[%s2202_s11 + $0x2d8] ss:$20 sps:$4 sm:$0xff]   ;;  %v1921_v15 = vld [vmem:[%s2202_s11 + $0x2fc] ss:$20 sps:$4 sm:$0xff]   ;;  %v2073_v24 = vmov 0.0  }
  0x51   : > { %977 = vmatprep.subr.bf16.mxu0 %v1844_v28  ;;  %1063 = vmatprep.subr.bf16.mxu1 %v1846_v29  ;;  %v1924_v16 = vld [vmem:[%s2202_s11 + $0x304] ss:$20 sps:$4 sm:$0xff]   ;;  %v1922_v18 = vld [vmem:[%s2202_s11 + $0x300] ss:$20 sps:$4 sm:$0xff]   ;;  %vm2074_vm1 = vmmov 0   ;;  %s268_s18 = smul.u32 5, %s2058_s15 }
  0x52   : > { %v1919_v17 = vld [vmem:[%s2202_s11 + $0x2f8] ss:$20 sps:$4 sm:$0xff]   ;;  %v1926_v19 = vld [vmem:[%s2202_s11 + $0x150] ss:$20 sps:$4 sm:$0xff]   ;;  %v1925_v20 = vld [vmem:[%s2419_s0 + $0x8] ss:$12 sps:$4 sm:$0xff]  }
  0x53   : > { %v1927_v21 = vld [vmem:[%s2202_s11 + $0x10] ss:$20 sps:$4 sm:$0xff]   ;;  %v1928_v23 = vld [vmem:[%s2202_s11 + $0x178] ss:$20 sps:$4 sm:$0xff]   ;;  %v1930_v27 = vld [vmem:[%s2202_s11 + $0x1a0] ss:$20 sps:$4 sm:$0xff]  }
  0x54   : > { %978 = vmatpush1.bf16.msra.mxu0 %v1848_v30  ;;  %1064 = vmatpush1.bf16.msra.mxu1 %v1849_v31  ;;  %v1936_v22 = vld [vmem:[%s2202_s11 + $0x290] ss:$20 sps:$4 sm:$0xff]   ;;  %v1929_v25 = vld [vmem:[%s2202_s11 + $0x38] ss:$20 sps:$4 sm:$0xff]   ;;  %v1931_v28 = vld [vmem:[%s2202_s11 + $0x60] ss:$20 sps:$4 sm:$0xff]  }
  0x55   : > { %979 = vmatprep.subr.bf16.mxu0 %v1850_v32  ;;  %1065 = vmatprep.subr.bf16.mxu1 %v1852_v33  ;;  %v1939_v26 = vld [vmem:[%s2202_s11 + $0x2b8] ss:$20 sps:$4 sm:$0xff]   ;;  %v1942_v29 = vld [vmem:[%s2202_s11 + $0x2e0] ss:$20 sps:$4 sm:$0xff]   ;;  %v1932_v30 = vld [vmem:[%s2202_s11 + $0x1c8] ss:$20 sps:$4 sm:$0xff]  }
  0x56   : > { %v1933_v31 = vld [vmem:[%s2202_s11 + $0x88] ss:$20 sps:$4 sm:$0xff]   ;;  %v1934_v33 = vld [vmem:[%s2202_s11 + $0x1f0] ss:$20 sps:$4 sm:$0xff]   ;;  %p269_p8 = scmp.lt.s32.totalorder %s268_s18, 9  ;;  %s1740_s26 = smul.u32 40, %s2198_s6 }
  0x57   : > { %v1945_v32 = vld [vmem:[%s2202_s11 + $0x308] ss:$20 sps:$4 sm:$0xff]   ;;  %p2428_p9 = scmp.ne.s32.totalorder %s2425_s25, 0 }
  0x58   : > { %980 = vmatpush1.bf16.msra.mxu0 %v1854_v34  ;;  %1066 = vmatpush1.bf16.msra.mxu1 %v1855_v35  ;;  %v1935_v34 = vld [vmem:[%s2202_s11 + $0xb0] ss:$20 sps:$4 sm:$0xff]   ;;  %v1937_v35 = vld [vmem:[%s2202_s11 + $0x218] ss:$20 sps:$4 sm:$0xff]   ;;  %s2437_s18 = smov (!%p269_p8, %s268_s18), 9  ;;  %s2379_s27 = scalar_lea.vmem [#allocation5], %s1740_s26 }
  0x59   : > { %981 = vmatprep.subr.bf16.mxu0 %v1856_v36  ;;  %1067 = vmatprep.subr.bf16.mxu1 %v1858_v37  ;;  %v1938_v36 = vld [vmem:[%s2202_s11 + $0xd8] ss:$20 sps:$4 sm:$0xff]   ;;  %v1940_v37 = vld [vmem:[%s2202_s11 + $0x240] ss:$20 sps:$4 sm:$0xff]   ;;  %s271_s22 = scalar_lea.vmem %s2421_s2, %s2437_s18  ;;  %s1690_s28 = smul.u32 (%p2428_p9), 20, %s2058_s15 }
  0x5b   : > { %s1407_s6 = scalar_lea.vmem (%p2428_p9), %s2422_s3, %s1690_s28 }
  0x5c   : > { %982 = vmatpush1.bf16.msra.mxu0 %v1860_v38  ;;  %1068 = vmatpush1.bf16.msra.mxu1 %v1861_v39  ;;  %v1941_v38 = vld [vmem:[%s2202_s11 + $0x100] ss:$20 sps:$4 sm:$0xff]   ;;  %v1943_v39 = vld [vmem:[%s2202_s11 + $0x268] ss:$20 sps:$4 sm:$0xff]  }
  0x5d   : > { %983 = vmatprep.subr.bf16.mxu0 %v1862_v40  ;;  %1069 = vmatprep.subr.bf16.mxu1 %v1864_v41  ;;  %v1944_v40 = vld [vmem:[%s2202_s11 + $0x128] ss:$20 sps:$4 sm:$0xff]   ;;  %v1252_v41 = vlaneseq }
  0x60   : > { %984 = vmatpush1.bf16.msra.mxu0 %v1866_v42  ;;  %1070 = vmatpush1.bf16.msra.mxu1 %v1867_v43  ;;  %v2331_v42 = vshrl.u32 %v1252_v41, 7 }
  0x61   : > { %985 = vmatprep.subr.bf16.mxu0 %v1868_v44  ;;  %1071 = vmatprep.subr.bf16.mxu1 %v1870_v45  ;;  %v2338_v45 = vld [vmem:[%s271_s22] sm:$0x1f] }
  0x62   : > { %v1254_v43 = vsub.s32 0, %v2331_v42  ;;  %v1262_v44 = vsub.s32 2, %v2331_v42  ;;  %v1270_v41 = vsub.s32 4, %v2331_v42 }
  0x64   : > { %986 = vmatpush1.bf16.msra.mxu0 %v1872_v46  ;;  %1072 = vmatpush1.bf16.msra.mxu1 %v1873_v48  ;;  %v1258_v46 = vsub.s32 1, %v2331_v42  ;;  %v1255_v48 = vrot.slane %v2338_v45, %v1254_v43 }
  0x65   : > { %987 = vmatprep.subr.bf16.mxu0 %v1874_v49  ;;  %1073 = vmatprep.subr.bf16.mxu1 %v1876_v50  ;;  %v1263_v49 = vrot.slane %v2338_v45, %v1262_v44 }
  0x66   : > { %v1259_v50 = vrot.slane %v2338_v45, %v1258_v46 }
  0x68   : > { %988 = vmatpush1.bf16.msra.mxu0 %v1878_v51  ;;  %1074 = vmatpush1.bf16.msra.mxu1 %v1879_v52 }
  0x69   : > { %989 = vmatprep.subr.bf16.mxu0 %v1880_v53  ;;  %1075 = vmatprep.subr.bf16.mxu1 %v1882_v54 }
  0x6c   : > { %990 = vmatpush1.bf16.msra.mxu0 %v1884_v55  ;;  %1076 = vmatpush1.bf16.msra.mxu1 %v1885_v56 }
  0x6d   : > { %991 = vmatprep.subr.bf16.mxu0 %v1886_v57  ;;  %1077 = vmatprep.subr.bf16.mxu1 %v1888_v58 }
  0x70   : > { %992 = vmatpush1.bf16.msra.mxu0 %v1890_v59  ;;  %1078 = vmatpush1.bf16.msra.mxu1 %v1891_v60 }
  0x71   : > { %993 = vmatprep.subr.bf16.mxu0 %v1892_v61  ;;  %1079 = vmatprep.subr.bf16.mxu1 %v1894_v62 }
  0x74   : > { %994 = vmatpush1.bf16.msra.mxu0 %v1896_v63  ;;  %1080 = vmatpush1.bf16.msra.mxu1 %v1897_v0 }
  0x75   : > { %1006 = vmatprep.subr.bf16.mxu0 %v1902_v1  ;;  %1092 = vmatprep.subr.bf16.mxu1 %v1905_v2 }
  0x77   : > { %996 = vmatmul.mubr.bf16.vlgmr.msra.gmra.mrb[0].mxu0 %v2286_v5  ;;  %1082 = vmatmul.mubr.bf16.vlgmr.msra.gmra.mrb[0].mxu1 %v2286_v5 }
  0x78   : > { %1007 = vmatpush1.bf16.msra.mxu0 %v1900_v3  ;;  %1093 = vmatpush1.bf16.msra.mxu1 %v1903_v4 }
  0x79   : > { %1008 = vmatprep.subr.bf16.mxu0 %v1909_v6  ;;  %1094 = vmatprep.subr.bf16.mxu1 %v1912_v7 }
  0x7a   : > { %1038 = vmatprep.mubr.bf16.mxu0 %v2072_v13  ;;  %1124 = vmatprep.mubr.bf16.mxu1 %v2072_v13 }
  0x7c   : > { %1009 = vmatpush1.bf16.msra.mxu0 %v1907_v8  ;;  %1095 = vmatpush1.bf16.msra.mxu1 %v1910_v9 }
  0x7d   : > { %1010 = vmatprep.subr.bf16.mxu0 %v1915_v10  ;;  %1096 = vmatprep.subr.bf16.mxu1 %v1918_v11 }
  0x80   : > { %1011 = vmatpush1.bf16.msra.mxu0 %v1913_v12  ;;  %1097 = vmatpush1.bf16.msra.mxu1 %v1916_v14 }
  0x81   : > { %1012 = vmatprep.subr.bf16.mxu0 %v1921_v15  ;;  %1098 = vmatprep.subr.bf16.mxu1 %v1924_v16 }
  0x84   : > { %1013 = vmatpush1.bf16.msra.mxu0 %v1919_v17  ;;  %1099 = vmatpush1.bf16.msra.mxu1 %v1922_v18 }
  0x85   : > { %1691 = vmatprep.subr.bf16.mxu0 %v1926_v19  ;;  %1718 = vmatprep.subr.bf16.mxu1 %v2073_v24 }
  0x87   : > { %1667 = vmatmul.mubr.msk.bf16.vlgmr.msra.gmra.mrb[0].mxu0 %vm959_vm0, %v1925_v20  ;;  %1668 = vmatmul.mubr.msk.bf16.vlgmr.msra.gmra.mrb[0].mxu1 %vm959_vm0, %v1925_v20 }
  0x88   : > { %1692 = vmatpush3.bf16.msra.mxu0 %v1927_v21  ;;  %1719 = vmatpush3.bf16.msra.mxu1 %v1936_v22 }
  0x89   : > { %1693 = vmatprep.subr.bf16.mxu0 %v1928_v23  ;;  %1720 = vmatprep.subr.bf16.mxu1 %v2073_v24 }
  0x8a   : > { %1167 = vmatprep.mubr.bf16.mxu0 %v2258_v47  ;;  %1726 = vmatprep.mubr.msk.bf16.mxu1 %vm2074_vm1, %v2073_v24  ;;  %v1266_v47 = vsub.s32 3, %v2331_v42 }
  0x8c   : > { %1694 = vmatpush3.bf16.msra.mxu0 %v1929_v25  ;;  %1721 = vmatpush3.bf16.msra.mxu1 %v1939_v26  ;;  %v1267_v51 = vrot.slane %v2338_v45, %v1266_v47 }
  0x8d   : > { %1695 = vmatprep.subr.bf16.mxu0 %v1930_v27  ;;  %1722 = vmatprep.subr.bf16.mxu1 %v2073_v24 }
  0x90   : > { %1696 = vmatpush3.bf16.msra.mxu0 %v1931_v28  ;;  %1723 = vmatpush3.bf16.msra.mxu1 %v1942_v29 }
  0x91   : > { %1697 = vmatprep.subr.bf16.mxu0 %v1932_v30  ;;  %1724 = vmatprep.subr.bf16.mxu1 %v2073_v24 }
  0x94   : > { %1698 = vmatpush3.bf16.msra.mxu0 %v1933_v31  ;;  %1725 = vmatpush3.bf16.msra.mxu1 %v1945_v32 }
  0x95   : > { %1699 = vmatprep.subr.bf16.mxu0 %v1934_v33 }
  0x97   : > { %1727 = vmatmul.mubr.msk.bf16.vlgmr.msra.gmra.mrb[4].mxu1 %vm959_vm0, %v1925_v20 }
  0x98   : > { %1700 = vmatpush3.bf16.msra.mxu0 %v1935_v34 }
  0x99   : > { %1701 = vmatprep.subr.bf16.mxu0 %v1937_v35 }
  0x9c   : > { %1702 = vmatpush3.bf16.msra.mxu0 %v1938_v36 }
  0x9d   : > { %1703 = vmatprep.subr.bf16.mxu0 %v1940_v37 }
  0xa0   : > { %1704 = vmatpush3.bf16.msra.mxu0 %v1941_v38 }
  0xa1   : > { %1705 = vmatprep.subr.bf16.mxu0 %v1943_v39 }
  0xa4   : > { %1706 = vmatpush3.bf16.msra.mxu0 %v1944_v40 }
  0xa7   : > { %1168 = vmatmul.mubr.bf16.vlgmr.msra.gmra.mrb[4].mxu0 %v2286_v5 }
 0x15a   : > { %v1040_v52 = vpop.f32.mrb[0].mxu0  ;;  %v1126_v53 = vpop.f32.mrb[0].mxu1 }
 0x15b   : > { %v2346_v54 = vadd.f32 %v1255_v48, %v1040_v52  ;;  %v2348_v55 = vadd.f32 %v1263_v49, %v1126_v53  ;;  %v1042_v56 = vpop.f32.mrb[1].mxu0  ;;  %v1128_v57 = vpop.f32.mrb[1].mxu1 }
 0x15c   : > { %v2350_v58 = vadd.f32 %v1259_v50, %v1042_v56  ;;  %v2352_v59 = vadd.f32 %v1267_v51, %v1128_v57  ;;  %v1044_v60 = vpop.f32.mrb[2].mxu0  ;;  %v1130_v61 = vpop.f32.mrb[2].mxu1  ;;  %v1271_v57 = vrot.slane %v2338_v45, %v1270_v41 }
 0x15d   : > { %v1287_v62 = vsub.f32 0.0, %v2346_v54  ;;  %v1289_v63 = vsub.f32 0.0, %v2348_v55  ;;  %v2356_v0 = vadd.f32 %v1255_v48, %v1044_v60  ;;  %v2358_v1 = vadd.f32 %v1263_v49, %v1130_v61  ;;  %v1046_v2 = vpop.f32.mrb[3].mxu0  ;;  %v1132_v3 = vpop.f32.mrb[3].mxu1 }
 0x15e   : > { %v1288_v4 = vsub.f32 0.0, %v2350_v58  ;;  %v1290_v5 = vsub.f32 0.0, %v2352_v59  ;;  %v2362_v6 = vadd.f32 %v1259_v50, %v1046_v2  ;;  %v2364_v7 = vadd.f32 %v1267_v51, %v1132_v3 }
 0x15f   : > { %v1297_v8 = vmul.f32 1.442695, %v1287_v62  ;;  %v1301_v9 = vmul.f32 1.442695, %v1289_v63  ;;  %v1292_v10 = vsub.f32 0.0, %v2356_v0  ;;  %v1294_v11 = vsub.f32 0.0, %v2358_v1 }
 0x160   : > { %v1299_v12 = vmul.f32 1.442695, %v1288_v4  ;;  %v1303_v13 = vmul.f32 1.442695, %v1290_v5  ;;  %v1293_v14 = vsub.f32 0.0, %v2362_v6  ;;  %v1295_v15 = vsub.f32 0.0, %v2364_v7 }
 0x161   : > { %1946 = vpow2.f32 %v1297_v8  ;;  %v1307_v16 = vmul.f32 1.442695, %v1292_v10  ;;  %v1311_v17 = vmul.f32 1.442695, %v1294_v11 }
 0x162   : > { %1948 = vpow2.f32 %v1301_v9  ;;  %v1309_v18 = vmul.f32 1.442695, %v1293_v14  ;;  %v1313_v19 = vmul.f32 1.442695, %v1295_v15 }
 0x163   : > { %1950 = vpow2.f32 %v1299_v12 }
 0x164   : > { %1952 = vpow2.f32 %v1303_v13 }
 0x165   : > { %1954 = vpow2.f32 %v1307_v16 }
 0x166   : > { %1956 = vpow2.f32 %v1311_v17 }
 0x167   : > { %1958 = vpow2.f32 %v1309_v18 }
 0x168   : > { %1960 = vpow2.f32 %v1313_v19 }
 0x16a   : > { %v1210_v20 = vpop.f32.mrb[4].mxu1 }
 0x16b   : > { %v1947_v21 = vpop.eup %1946  ;;  %v1728_v22 = vpop.f32.mrb[5].mxu1 }
 0x16c   : > { %v1949_v23 = vpop.eup %1948  ;;  %v1317_v24 = vadd.f32 1.0, %v1947_v21  ;;  %v1213_v25 = vpop.f32.mrb[6].mxu1 }
 0x16d   : > { %v1951_v26 = vpop.eup %1950  ;;  %v1319_v27 = vadd.f32 1.0, %v1949_v23  ;;  %v1729_v28 = vpop.f32.mrb[7].mxu1 }
 0x16e   : > { %v1953_v29 = vpop.eup %1952  ;;  %1962 = vrcp.f32 %v1317_v24  ;;  %v1318_v30 = vadd.f32 1.0, %v1951_v26 }
 0x16f   : > { %v1955_v31 = vpop.eup %1954  ;;  %1964 = vrcp.f32 %v1319_v27  ;;  %v1320_v32 = vadd.f32 1.0, %v1953_v29 }
 0x170   : > { %v1957_v33 = vpop.eup %1956  ;;  %1966 = vrcp.f32 %v1318_v30  ;;  %v1322_v34 = vadd.f32 1.0, %v1955_v31 }
 0x171   : > { %v1959_v35 = vpop.eup %1958  ;;  %1968 = vrcp.f32 %v1320_v32  ;;  %v1324_v36 = vadd.f32 1.0, %v1957_v33 }
 0x172   : > { %v1961_v37 = vpop.eup %1960  ;;  %1970 = vrcp.f32 %v1322_v34  ;;  %v1323_v38 = vadd.f32 1.0, %v1959_v35 }
 0x173   : > { %1972 = vrcp.f32 %v1324_v36  ;;  %v1325_v39 = vadd.f32 1.0, %v1961_v37 }
 0x174   : > { %1974 = vrcp.f32 %v1323_v38 }
 0x175   : > { %1976 = vrcp.f32 %v1325_v39 }
 0x178   : > { %v1963_v40 = vpop.eup %1962 }
 0x179   : > { %v1965_v43 = vpop.eup %1964  ;;  %v1347_v44 = vmul.f32 %v1963_v40, %v2346_v54 }
 0x17a   : > { %v1967_v46 = vpop.eup %1966  ;;  %v1349_v47 = vmul.f32 %v1965_v43, %v2348_v55  ;;  %v1707_v48 = vpop.f32.mrb[4].mxu0 }
 0x17b   : > { %v1969_v49 = vpop.eup %1968  ;;  %v1348_v50 = vmul.f32 %v1967_v46, %v2350_v58  ;;  %v1708_v51 = vpop.f32.mrb[5].mxu0 }
 0x17c   : > { %v1971_v52 = vpop.eup %1970  ;;  %v1350_v53 = vmul.f32 %v1969_v49, %v2352_v59  ;;  %v1709_v56 = vadd.f32 %v1708_v51, %v1707_v48  ;;  %v1710_v60 = vpop.f32.mrb[6].mxu0 }
 0x17d   : > { %v1973_v61 = vpop.eup %1972  ;;  %v1684_v42 = vpack.c.bf16 %v1348_v50, %v1347_v44  ;;  %v1352_v62 = vmul.f32 %v1971_v52, %v2356_v0  ;;  %v1711_v54 = vpop.f32.mrb[7].mxu0 }
 0x17e   : > { %v1975_v63 = vpop.eup %1974  ;;  %v1685_v2 = vpack.c.bf16 %v1350_v53, %v1349_v47  ;;  %v1354_v55 = vmul.f32 %v1973_v61, %v2358_v1  ;;  %v1211_v3 = vadd.f32 %v1709_v56, %v1210_v20  ;;  %v1712_v4 = vadd.f32 %v1711_v54, %v1710_v60 }
 0x17f   : > { %v1977_v58 = vpop.eup %1976  ;;  %1389 = vst [vmem:[%s2379_s27] sm:$0xff] %v1684_v42  ;;  %v1353_v45 = vmul.f32 %v1975_v63, %v2362_v6 }
 0x180   : > { %1390 = vst [vmem:[%s2379_s27 + $0x8] sm:$0xff] %v1685_v2  ;;  %v1355_v59 = vmul.f32 %v1977_v58, %v2364_v7  ;;  %v1281_v0 = vadd.f32 %v1271_v57, %v1211_v3  ;;  %v1214_v5 = vadd.f32 %v1712_v4, %v1213_v25 }
 0x181   : > { %v1687_v8 = vpack.c.bf16 %v1353_v45, %v1352_v62 }
 0x182   : > { %v1688_v9 = vpack.c.bf16 %v1355_v59, %v1354_v55  ;;  %v1291_v1 = vsub.f32 0.0, %v1281_v0  ;;  %v1286_v10 = vadd.f32 %v1271_v57, %v1214_v5 }
 0x183   : > { %1392 = vst [vmem:[%s2379_s27 + $0x14] sm:$0xff] %v1687_v8 }
 0x184   : > { %1393 = vst [vmem:[%s2379_s27 + $0x1c] sm:$0xff] %v1688_v9  ;;  %v1305_v11 = vmul.f32 1.442695, %v1291_v1  ;;  %v1296_v12 = vsub.f32 0.0, %v1286_v10 }
 0x186   : > { %1978 = vpow2.f32 %v1305_v11  ;;  %v1315_v13 = vmul.f32 1.442695, %v1296_v12  ;;  %v1422_v22 = vld [vmem:[%s2379_s27] sm:$0xff] (%p2428_p9) }
 0x187   : > { %v1424_v23 = vld [vmem:[%s2379_s27 + $0x8] sm:$0xff] (%p2428_p9)  ;;  %1423 = vst [vmem:[%s1407_s6] sm:$0xff] (%p2428_p9), %v1422_v22 }
 0x188   : > { %1980 = vpow2.f32 %v1315_v13  ;;  %1425 = vst [vmem:[%s1407_s6 + $0x8] sm:$0xff] (%p2428_p9), %v1424_v23 }
 0x18a   : > { %v1426_v24 = vld [vmem:[%s2379_s27 + $0x14] sm:$0xff] (%p2428_p9) }
 0x18b   : > { %v1428_v25 = vld [vmem:[%s2379_s27 + $0x1c] sm:$0xff] (%p2428_p9)  ;;  %1427 = vst [vmem:[%s1407_s6 + $0x28] sm:$0xff] (%p2428_p9), %v1426_v24 }
 0x18c   : > { %1429 = vst [vmem:[%s1407_s6 + $0x30] sm:$0xff] (%p2428_p9), %v1428_v25 }
 0x190   : > { %v1979_v14 = vpop.eup %1978 }
 0x191   : > { %v1321_v6 = vadd.f32 1.0, %v1979_v14 }
 0x192   : > { %v1981_v15 = vpop.eup %1980 }
 0x193   : > { %1982 = vrcp.f32 %v1321_v6  ;;  %v1326_v7 = vadd.f32 1.0, %v1981_v15 }
 0x195   : > { %1984 = vrcp.f32 %v1326_v7 }
 0x19d   : > { %v1983_v16 = vpop.eup %1982 }
 0x19e   : > { %v1351_v17 = vmul.f32 %v1983_v16, %v1281_v0  ;;  %1401 = sbr.rel (!%p2428_p9) target bundleno = 429 (0x1ad), region = 48 }
 0x19f   : > { %v1985_v18 = vpop.eup %1984 }
 0x1a0   : > { %v1686_v19 = vpack.c.bf16 %v1351_v17, %v1351_v17  ;;  %v1356_v20 = vmul.f32 %v1985_v18, %v1286_v10 }
 0x1a2   : > { %1391 = vst [vmem:[%s2379_s27 + $0x10] sm:$0xf] %v1686_v19  ;;  %v1689_v21 = vpack.c.bf16 %v1356_v20, %v1356_v20 }
 0x1a4   : > { %1394 = vst [vmem:[%s2379_s27 + $0x24] sm:$0xf] %v1689_v21 }
 0x1a9   : > { %v1677_v26 = vld [vmem:[%s2379_s27 + $0x10] sm:$0xf] }
 0x1aa   : > { %1678 = vst [vmem:[%s1407_s6 + $0x10] sm:$0xf] %v1677_v26 }
 0x1ab   : > { %v1679_v27 = vld [vmem:[%s2379_s27 + $0x24] sm:$0xf] }
 0x1ac   : > { %1680 = vst [vmem:[%s1407_s6 + $0x38] sm:$0xf] %v1679_v27 }
 0x1ad PF: > { %s16_s17 = sadd.s32 1, %s2066_s17   ;;  %s2429_s12 = smov %s2050_s13 }
 0x1ae   : > { %p13_p11 = scmp.ge.s32.totalorder %s16_s17, 4   ;;  %s2430_s13 = smov %s2054_s14 }
 0x1af   : > { %s2431_s14 = smov %s2143_s24  ;;  %s2432_s15 = smov %s2062_s16 }
 0x1b0   : > { %s2433_s16 = smov %s2435_s19  ;;  %15 = sbr.rel (!%p13_p11) target bundleno = 4 (0x4), region = 118 }
 0x1b7   :  { %1456 = vsyncpa [#allocation4], 1 }
 0x1b8   :  { %1458 = vsyncpa [#allocation4 + $0x1], 1 }

</bundles_post_ra>
